<compile_context>
chip_gen: v6e
topology: v6e:2x2x1
jax: 0.10.0
libtpu: 0.0.40
codegen_flags: <defaults>
</compile_context>

<pallas_src>
import jax
import jax.numpy as jnp
from jax import lax
from jax.experimental import pallas as pl
from jax.experimental.pallas import tpu as pltpu

EPS = 1e-5           # nn.BatchNorm2d default eps
NEG_SLOPE = 0.01     # nn.LeakyReLU() default negative_slope


def _conv_stats_kernel(p_ref, w_ref, y_ref, sum_ref, ssq_ref):
    # p_ref   : (K, TILE)    bf16 im2col patches for (batch n, spatial tile t)
    # w_ref   : (Cout, K)    bf16 flattened conv weight
    # y_ref   : (Cout, TILE) f32  conv output tile (lane-dense: spatial on lanes)
    # sum_ref : (Cout, 1)    f32  resident accumulator (same block every step)
    # ssq_ref : (Cout, 1)    f32  resident accumulator
    n = pl.program_id(0)
    t = pl.program_id(1)

    @pl.when((n == 0) & (t == 0))
    def _init():
        sum_ref[...] = jnp.zeros_like(sum_ref)
        ssq_ref[...] = jnp.zeros_like(ssq_ref)

    # Conv as matmul: bf16 operands, f32 accumulation on the MXU.
    # Orientation [Cout, K] x [K, TILE] makes the wide spatial dim the MXU
    # lane/output dim (full-width result vregs + lane-dense stores).
    y = jnp.dot(w_ref[...], p_ref[...], preferred_element_type=jnp.float32)
    y_ref[...] = y

    # Single-pass fused stats: sum and sum-of-squares per channel.
    sum_ref[...] += jnp.sum(y, axis=-1, keepdims=True)
    ssq_ref[...] += jnp.sum(y * y, axis=-1, keepdims=True)


def _norm_lrelu_kernel(y_ref, scale_ref, shift_ref, o_ref):
    # Folded BatchNorm (scale/shift) + LeakyReLU; lane-dense load & store.
    yn = y_ref[...] * scale_ref[...] + shift_ref[...]
    o_ref[...] = jnp.where(yn >= 0, yn, NEG_SLOPE * yn).astype(o_ref.dtype)


def _pick_tile(hw, target=2048):
    """Largest multiple of 128 that divides hw and is <= target; else hw (full dim)."""
    best = None
    t = 128
    while t <= min(hw, target):
        if hw % t == 0:
            best = t
        t += 128
    return best if best is not None else hw


def basic_conv_bn_lrelu(x_nchw, weight, *, stride=1, padding=1,
                        gamma=None, beta=None, eps=EPS,
                        compute_dtype=jnp.bfloat16):
    """x_nchw: [N, Cin, H, W], weight: [Cout, Cin, Kh, Kw] (PyTorch layouts).

    Matches BasicConv(bn=True, relu=True).forward in training mode:
    Conv2d(no bias) -> BatchNorm2d (batch stats, biased var, eps=1e-5,
    gamma=1/beta=0 unless given) -> LeakyReLU(0.01). Returns NCHW float32.
    """
    N, Cin, H, W = x_nchw.shape
    Cout, Cin_w, Kh, Kw = weight.shape
    assert Cin_w == Cin

    Ho = (H + 2 * padding - Kh) // stride + 1
    Wo = (W + 2 * padding - Kw) // stride + 1
    HW = Ho * Wo
    K = Kh * Kw * Cin

    # ---- glue (XLA, indexing only): im2col -> [N, K, HW] in bf16 ----
    # TODO(synk): for large Cin*H*W replace the materialized im2col with an
    # in-kernel Kh*Kw shift-and-accumulate to avoid the 9x HBM blowup.
    x_nhwc = jnp.transpose(x_nchw, (0, 2, 3, 1))                      # [N,H,W,Cin]
    xp = jnp.pad(x_nhwc, ((0, 0), (padding, padding), (padding, padding), (0, 0)))
    taps = []
    for dh in range(Kh):
        for dw in range(Kw):
            taps.append(lax.slice(
                xp,
                (0, dh, dw, 0),
                (N, dh + (Ho - 1) * stride + 1, dw + (Wo - 1) * stride + 1, Cin),
                (1, stride, stride, 1)))                              # [N,Ho,Wo,Cin]
    patches = jnp.stack(taps, axis=1)                                 # [N,KhKw,Ho,Wo,Cin]
    patches = jnp.transpose(patches, (0, 1, 4, 2, 3))                 # [N,KhKw,Cin,Ho,Wo]
    patches = patches.reshape(N, K, HW).astype(compute_dtype)         # K order: (kh,kw,cin)

    # ---- glue: flatten weight to [Cout, K] with matching (kh, kw, cin) order ----
    w_mat = jnp.transpose(weight, (0, 2, 3, 1)).reshape(Cout, K).astype(compute_dtype)

    TILE = _pick_tile(HW)
    T = HW // TILE

    # ---- kernel 1: conv (MXU) + per-channel sum / sum-of-squares ----
    y, s, ss = pl.pallas_call(
        _conv_stats_kernel,
        out_shape=(
            jax.ShapeDtypeStruct((N, Cout, HW), jnp.float32),
            jax.ShapeDtypeStruct((Cout, 1), jnp.float32),
            jax.ShapeDtypeStruct((Cout, 1), jnp.float32),
        ),
        grid_spec=pltpu.PrefetchScalarGridSpec(
            num_scalar_prefetch=0,
            grid=(N, T),
            in_specs=[
                pl.BlockSpec((None, K, TILE), lambda n, t: (n, 0, t)),
                pl.BlockSpec((Cout, K), lambda n, t: (0, 0)),
            ],
            out_specs=[
                pl.BlockSpec((None, Cout, TILE), lambda n, t: (n, 0, t)),
                pl.BlockSpec((Cout, 1), lambda n, t: (0, 0)),
                pl.BlockSpec((Cout, 1), lambda n, t: (0, 0)),
            ],
        ),
        compiler_params=pltpu.CompilerParams(
            dimension_semantics=("arbitrary", "arbitrary")),
    )(patches, w_mat)

    # ---- glue: fold BatchNorm into per-channel scale/shift (tiny, f32) ----
    cnt = float(N * HW)
    mean = s / cnt                                                    # [Cout,1]
    var = jnp.maximum(ss / cnt - mean * mean, 0.0)                    # biased var, clamped
    scale = lax.rsqrt(var + eps)
    shift = -mean * scale
    if gamma is not None:
        g = jnp.asarray(gamma, jnp.float32).reshape(Cout, 1)
        b = (jnp.zeros((Cout, 1), jnp.float32) if beta is None
             else jnp.asarray(beta, jnp.float32).reshape(Cout, 1))
        shift = shift * g + b
        scale = scale * g

    # ---- kernel 2: normalize + LeakyReLU (fully parallel grid) ----
    out = pl.pallas_call(
        _norm_lrelu_kernel,
        out_shape=jax.ShapeDtypeStruct((N, Cout, HW), jnp.float32),
        grid_spec=pltpu.PrefetchScalarGridSpec(
            num_scalar_prefetch=0,
            grid=(N, T),
            in_specs=[
                pl.BlockSpec((None, Cout, TILE), lambda n, t: (n, 0, t)),
                pl.BlockSpec((Cout, 1), lambda n, t: (0, 0)),
                pl.BlockSpec((Cout, 1), lambda n, t: (0, 0)),
            ],
            out_specs=pl.BlockSpec((None, Cout, TILE), lambda n, t: (n, 0, t)),
        ),
        compiler_params=pltpu.CompilerParams(
            dimension_semantics=("parallel", "parallel")),
    )(y, scale, shift)

    # Channel-major kernel output reshapes straight to NCHW: no final transpose.
    return out.reshape(N, Cout, Ho, Wo)


if __name__ == "__main__":
    # Shapes consistent with BasicConv(4, 8, kernel_size=3, stride=1, padding=1)
    N, Cin, H, W = 2, 4, 16, 16
    Cout, Kh, Kw = 8, 3, 3

    key = jax.random.PRNGKey(0)
    kx, kw_ = jax.random.split(key)
    x = jax.random.normal(kx, (N, Cin, H, W), dtype=jnp.float32)
    weight = 0.1 * jax.random.normal(kw_, (Cout, Cin, Kh, Kw), dtype=jnp.float32)

    run = jax.jit(lambda xx, ww: basic_conv_bn_lrelu(xx, ww, stride=1, padding=1))
    out = jax.block_until_ready(run(x, weight))
    assert out.shape == (N, Cout, H, W)

    # Pure-JAX reference: Conv2d(no bias) -> BatchNorm2d (training-mode batch
    # stats, biased var, eps=1e-5, gamma=1, beta=0) -> LeakyReLU(0.01).
    def reference(xq, wq, precision=None):
        conv = lax.conv_general_dilated(
            xq, wq, window_strides=(1, 1), padding=((1, 1), (1, 1)),
            dimension_numbers=("NCHW", "OIHW", "NCHW"), precision=precision)
        mean = jnp.mean(conv, axis=(0, 2, 3), keepdims=True)
        var = jnp.mean((conv - mean) ** 2, axis=(0, 2, 3), keepdims=True)
        yn = (conv - mean) * lax.rsqrt(var + EPS)
        return jnp.where(yn >= 0, yn, NEG_SLOPE * yn)

    # Tight check vs a reference fed the same bf16-quantized operands (isolates
    # only accumulation-order / stats-path differences).
    xq = x.astype(jnp.bfloat16).astype(jnp.float32)
    wq = weight.astype(jnp.bfloat16).astype(jnp.float32)
    err_q = jnp.max(jnp.abs(out - reference(xq, wq)))
    assert err_q < 2e-3, err_q

    # Loose sanity check vs the full-f32 reference (bf16 MXU inputs only).
    err_f32 = jnp.max(jnp.abs(out - reference(x, weight, precision=lax.Precision.HIGHEST)))
    assert err_f32 < 1e-1, err_f32

    print("KERNEL_OK")
</pallas_src>

<mosaic_0001>
module attributes {stable_mosaic.version = 11 : i64} {
  func.func @_conv_stats_kernel(%arg0: i32, %arg1: i32, %arg2: memref<1x36x256xbf16, #tpu.memory_space<vmem>>, %arg3: memref<8x36xbf16, #tpu.memory_space<vmem>>, %arg4: memref<1x8x256xf32, #tpu.memory_space<vmem>>, %arg5: memref<8x1xf32, #tpu.memory_space<vmem>>, %arg6: memref<8x1xf32, #tpu.memory_space<vmem>>) attributes {dimension_semantics = [#tpu.dimension_semantics<arbitrary>, #tpu.dimension_semantics<arbitrary>], iteration_bounds = array<i64: 2, 1>, scalar_prefetch = 0 : i64, scratch_operands = 0 : i64, tpu.core_type = #tpu.core_type<tc>, window_params = [{transform_indices = @transform_0, window_bounds = array<i64: 1, 36, 256>}, {pipeline_mode = #tpu.pipeline_mode<synchronous>, transform_indices = @transform_1, window_bounds = array<i64: 8, 36>}, {transform_indices = @transform_2, window_bounds = array<i64: 1, 8, 256>}, {pipeline_mode = #tpu.pipeline_mode<synchronous>, transform_indices = @transform_3, window_bounds = array<i64: 8, 1>}, {pipeline_mode = #tpu.pipeline_mode<synchronous>, transform_indices = @transform_4, window_bounds = array<i64: 8, 1>}]} {
    %c0_i32 = arith.constant 0 : i32
    %0 = arith.cmpi eq, %arg0, %c0_i32 : i32
    %c0_i32_0 = arith.constant 0 : i32
    %1 = arith.cmpi eq, %arg1, %c0_i32_0 : i32
    %2 = arith.andi %0, %1 : i1
    %3 = arith.extui %2 : i1 to i32
    %c0_i32_1 = arith.constant 0 : i32
    %4 = arith.cmpi ne, %3, %c0_i32_1 : i32
    scf.if %4 {
      %cst_19 = arith.constant 0.000000e+00 : f32
      %23 = vector.broadcast %cst_19 : f32 to vector<8x1xf32>
      %c0_20 = arith.constant 0 : index
      %c0_21 = arith.constant 0 : index
      %24 = vector.load %arg5[%c0_20, %c0_21] : memref<8x1xf32, #tpu.memory_space<vmem>>, vector<8x1xf32>
      tpu.vector_store %arg5[%c0_20, %c0_21], %23 {strides = array<i32>} : memref<8x1xf32, #tpu.memory_space<vmem>>, vector<8x1xf32>,
      %cst_22 = arith.constant 0.000000e+00 : f32
      %25 = vector.broadcast %cst_22 : f32 to vector<8x1xf32>
      %c0_23 = arith.constant 0 : index
      %c0_24 = arith.constant 0 : index
      %26 = vector.load %arg6[%c0_23, %c0_24] : memref<8x1xf32, #tpu.memory_space<vmem>>, vector<8x1xf32>
      tpu.vector_store %arg6[%c0_23, %c0_24], %25 {strides = array<i32>} : memref<8x1xf32, #tpu.memory_space<vmem>>, vector<8x1xf32>,
    } else {
    }
    %c0 = arith.constant 0 : index
    %c0_2 = arith.constant 0 : index
    %5 = vector.load %arg3[%c0, %c0_2] : memref<8x36xbf16, #tpu.memory_space<vmem>>, vector<8x36xbf16>
    %c0_3 = arith.constant 0 : index
    %c0_4 = arith.constant 0 : index
    %c0_5 = arith.constant 0 : index
    %6 = vector.load %arg2[%c0_3, %c0_4, %c0_5] : memref<1x36x256xbf16, #tpu.memory_space<vmem>>, vector<1x36x256xbf16>
    %7 = vector.shape_cast %6 : vector<1x36x256xbf16> to vector<36x256xbf16>
    %cst = arith.constant dense<0.000000e+00> : vector<8x256xf32>
    %8 = tpu.matmul %5, %7, %cst {dimension_numbers = #tpu.dot_dimension_numbers<[1], [0], [0], [1], [0, 0, 1, 1], [], []>} : vector<8x36xbf16>, vector<36x256xbf16>, vector<8x256xf32> -> vector<8x256xf32>
    %c0_6 = arith.constant 0 : index
    %c0_7 = arith.constant 0 : index
    %c0_8 = arith.constant 0 : index
    %9 = vector.load %arg4[%c0_6, %c0_7, %c0_8] : memref<1x8x256xf32, #tpu.memory_space<vmem>>, vector<1x8x256xf32>
    %10 = vector.shape_cast %9 : vector<1x8x256xf32> to vector<8x256xf32>
    %11 = vector.shape_cast %8 : vector<8x256xf32> to vector<1x8x256xf32>
    tpu.vector_store %arg4[%c0_6, %c0_7, %c0_8], %11 {strides = array<i32>} : memref<1x8x256xf32, #tpu.memory_space<vmem>>, vector<1x8x256xf32>,
    %c0_9 = arith.constant 0 : index
    %c0_10 = arith.constant 0 : index
    %12 = vector.load %arg5[%c0_9, %c0_10] : memref<8x1xf32, #tpu.memory_space<vmem>>, vector<8x1xf32>
    %cst_11 = arith.constant dense<0.000000e+00> : vector<8xf32>
    %13 = vector.multi_reduction <add>, %8, %cst_11 [1] : vector<8x256xf32> to vector<8xf32>
    %14 = vector.shape_cast %13 : vector<8xf32> to vector<8x1xf32>
    %15 = arith.addf %12, %14 : vector<8x1xf32>
    %c0_12 = arith.constant 0 : index
    %c0_13 = arith.constant 0 : index
    %16 = vector.load %arg5[%c0_12, %c0_13] : memref<8x1xf32, #tpu.memory_space<vmem>>, vector<8x1xf32>
    tpu.vector_store %arg5[%c0_12, %c0_13], %15 {strides = array<i32>} : memref<8x1xf32, #tpu.memory_space<vmem>>, vector<8x1xf32>,
    %c0_14 = arith.constant 0 : index
    %c0_15 = arith.constant 0 : index
    %17 = vector.load %arg6[%c0_14, %c0_15] : memref<8x1xf32, #tpu.memory_space<vmem>>, vector<8x1xf32>
    %18 = arith.mulf %8, %8 : vector<8x256xf32>
    %cst_16 = arith.constant dense<0.000000e+00> : vector<8xf32>
    %19 = vector.multi_reduction <add>, %18, %cst_16 [1] : vector<8x256xf32> to vector<8xf32>
    %20 = vector.shape_cast %19 : vector<8xf32> to vector<8x1xf32>
    %21 = arith.addf %17, %20 : vector<8x1xf32>
    %c0_17 = arith.constant 0 : index
    %c0_18 = arith.constant 0 : index
    %22 = vector.load %arg6[%c0_17, %c0_18] : memref<8x1xf32, #tpu.memory_space<vmem>>, vector<8x1xf32>
    tpu.vector_store %arg6[%c0_17, %c0_18], %21 {strides = array<i32>} : memref<8x1xf32, #tpu.memory_space<vmem>>, vector<8x1xf32>,
    return
  }
  func.func @transform_0(%arg0: i32, %arg1: i32) -> (i32, i32, i32) {
    %c0_i32 = arith.constant 0 : i32
    %c0_i32_0 = arith.constant 0 : i32
    return %arg0, %c0_i32, %arg1 : i32, i32, i32
  }
  func.func @transform_1(%arg0: i32, %arg1: i32) -> (i32, i32) {
    %c0_i32 = arith.constant 0 : i32
    %c0_i32_0 = arith.constant 0 : i32
    %c0_i32_1 = arith.constant 0 : i32
    return %c0_i32, %c0_i32_0 : i32, i32
  }
  func.func @transform_2(%arg0: i32, %arg1: i32) -> (i32, i32, i32) {
    %c0_i32 = arith.constant 0 : i32
    %c0_i32_0 = arith.constant 0 : i32
    return %arg0, %c0_i32, %arg1 : i32, i32, i32
  }
  func.func @transform_3(%arg0: i32, %arg1: i32) -> (i32, i32) {
    %c0_i32 = arith.constant 0 : i32
    %c0_i32_0 = arith.constant 0 : i32
    %c0_i32_1 = arith.constant 0 : i32
    return %c0_i32, %c0_i32_0 : i32, i32
  }
  func.func @transform_4(%arg0: i32, %arg1: i32) -> (i32, i32) {
    %c0_i32 = arith.constant 0 : i32
    %c0_i32_0 = arith.constant 0 : i32
    %c0_i32_1 = arith.constant 0 : i32
    return %c0_i32, %c0_i32_0 : i32, i32
  }
}

module attributes {stable_mosaic.version = 11 : i64} {
  func.func @_norm_lrelu_kernel(%arg0: i32, %arg1: i32, %arg2: memref<1x8x256xf32, #tpu.memory_space<vmem>>, %arg3: memref<8x1xf32, #tpu.memory_space<vmem>>, %arg4: memref<8x1xf32, #tpu.memory_space<vmem>>, %arg5: memref<1x8x256xf32, #tpu.memory_space<vmem>>) attributes {dimension_semantics = [#tpu.dimension_semantics<parallel>, #tpu.dimension_semantics<parallel>], iteration_bounds = array<i64: 2, 1>, scalar_prefetch = 0 : i64, scratch_operands = 0 : i64, tpu.core_type = #tpu.core_type<tc>, window_params = [{transform_indices = @transform_0, window_bounds = array<i64: 1, 8, 256>}, {pipeline_mode = #tpu.pipeline_mode<synchronous>, transform_indices = @transform_1, window_bounds = array<i64: 8, 1>}, {pipeline_mode = #tpu.pipeline_mode<synchronous>, transform_indices = @transform_2, window_bounds = array<i64: 8, 1>}, {transform_indices = @transform_3, window_bounds = array<i64: 1, 8, 256>}]} {
    %c0 = arith.constant 0 : index
    %c0_0 = arith.constant 0 : index
    %c0_1 = arith.constant 0 : index
    %0 = vector.load %arg2[%c0, %c0_0, %c0_1] : memref<1x8x256xf32, #tpu.memory_space<vmem>>, vector<1x8x256xf32>
    %1 = vector.shape_cast %0 : vector<1x8x256xf32> to vector<8x256xf32>
    %c0_2 = arith.constant 0 : index
    %c0_3 = arith.constant 0 : index
    %2 = vector.load %arg3[%c0_2, %c0_3] : memref<8x1xf32, #tpu.memory_space<vmem>>, vector<8x1xf32>
    %3 = vector.broadcast %2 : vector<8x1xf32> to vector<8x256xf32>
    %4 = arith.mulf %1, %3 : vector<8x256xf32>
    %c0_4 = arith.constant 0 : index
    %c0_5 = arith.constant 0 : index
    %5 = vector.load %arg4[%c0_4, %c0_5] : memref<8x1xf32, #tpu.memory_space<vmem>>, vector<8x1xf32>
    %6 = vector.broadcast %5 : vector<8x1xf32> to vector<8x256xf32>
    %7 = arith.addf %4, %6 : vector<8x256xf32>
    %cst = arith.constant 0.000000e+00 : f32
    %8 = vector.broadcast %cst : f32 to vector<8x256xf32>
    %9 = arith.cmpf oge, %7, %8 : vector<8x256xf32>
    %cst_6 = arith.constant 0.00999999977 : f32
    %10 = vector.broadcast %cst_6 : f32 to vector<8x256xf32>
    %11 = arith.mulf %10, %7 : vector<8x256xf32>
    %12 = arith.select %9, %7, %11 : vector<8x256xi1>, vector<8x256xf32>
    %c0_7 = arith.constant 0 : index
    %c0_8 = arith.constant 0 : index
    %c0_9 = arith.constant 0 : index
    %13 = vector.load %arg5[%c0_7, %c0_8, %c0_9] : memref<1x8x256xf32, #tpu.memory_space<vmem>>, vector<1x8x256xf32>
    %14 = vector.shape_cast %13 : vector<1x8x256xf32> to vector<8x256xf32>
    %15 = vector.shape_cast %12 : vector<8x256xf32> to vector<1x8x256xf32>
    tpu.vector_store %arg5[%c0_7, %c0_8, %c0_9], %15 {strides = array<i32>} : memref<1x8x256xf32, #tpu.memory_space<vmem>>, vector<1x8x256xf32>,
    return
  }
  func.func @transform_0(%arg0: i32, %arg1: i32) -> (i32, i32, i32) {
    %c0_i32 = arith.constant 0 : i32
    %c0_i32_0 = arith.constant 0 : i32
    return %arg0, %c0_i32, %arg1 : i32, i32, i32
  }
  func.func @transform_1(%arg0: i32, %arg1: i32) -> (i32, i32) {
    %c0_i32 = arith.constant 0 : i32
    %c0_i32_0 = arith.constant 0 : i32
    %c0_i32_1 = arith.constant 0 : i32
    return %c0_i32, %c0_i32_0 : i32, i32
  }
  func.func @transform_2(%arg0: i32, %arg1: i32) -> (i32, i32) {
    %c0_i32 = arith.constant 0 : i32
    %c0_i32_0 = arith.constant 0 : i32
    %c0_i32_1 = arith.constant 0 : i32
    return %c0_i32, %c0_i32_0 : i32, i32
  }
  func.func @transform_3(%arg0: i32, %arg1: i32) -> (i32, i32, i32) {
    %c0_i32 = arith.constant 0 : i32
    %c0_i32_0 = arith.constant 0 : i32
    return %arg0, %c0_i32, %arg1 : i32, i32, i32
  }
}

</mosaic_0001>

<bundles_post_ra>
// kernel: _lambda_.3
= control target key start
LH: loop header
LB: loop body
LE: loop exit
PB: predicated region body
PF: predicated region fallthrough
CT: control target
= control target key end

     0   :  { %s407_s12 = smov 0   ;;  %s409_s13 = smov 0   ;;  %s446_s0 = inlined_call_operand.vmem [shape: f32[2,8,256], index: 0, kind: input, shape index: {}]   ;;  %s447_s1 = inlined_call_operand.vmem [shape: f32[8,1], index: 1, kind: input, shape index: {}]   ;;  %s448_s2 = inlined_call_operand.vmem [shape: f32[8,1], index: 2, kind: input, shape index: {}]   ;;  %s449_s3 = inlined_call_operand.vmem [shape: f32[2,8,256], index: 3, kind: output, shape index: {}]  }
   0x1   :  { %s411_s14 = smov 0  }
   0x2 LB: > { %s25_s15 = sadd.s32 1, %s380_s13  ;;  %p327_p0 = scmp.ge.s32.totalorder %s384_s14, 1  ;;  %s384_s14 = sphi %s411_s14, %s13_s14   ;;  %s380_s13 = sphi %s409_s13, %s451_s13   ;;  %s376_s12 = sphi %s407_s12, %s450_s12  }
   0x3   : > { %p27_p1 = scmp.ge.s32.totalorder %s25_s15, 2  ;;  %p158_p2 = scmp.lt.s32.totalorder %s384_s14, 3 }
   0x5   : > { %s453_s15 = smov (%p27_p1, %s25_s15), 0  ;;  %p159_p3 = pnand %p327_p0, %p158_p2 }
   0x6   : > { %p191_p4 = scmp.lt.s32.totalorder (!%p159_p3), %s376_s12, 1 }
   0x7   : > { %162 = sbr.rel (%p159_p3) target bundleno = 148 (0x94), region = 32 }
   0xc   : > { %v212_v0 = vld [vmem:[%s447_s1] sm:$0xff]  ;;  %v386_v1 = vmov 0   ;;  %s455_s12 = smov (!%p191_p4, %s376_s12), 1 }
   0xd   : > { %361 = vset.pattern.permute.xlu0 %v386_v1  ;;  %v220_v2 = vld [vmem:[%s448_s2] sm:$0xff]  ;;  %s334_s20 = sshll.u32 %s455_s12, 4 }
   0xe   : > { %215 = vperm.xlu0 %361, %v212_v0   ;;  %s198_s23 = scalar_lea.vmem %s446_s0, %s334_s20  ;;  %s208_s26 = scalar_lea.vmem %s449_s3, %s334_s20 }
   0xf   : > { %v210_v4 = vld [vmem:[%s198_s23] sm:$0xff]  ;;  %v211_v5 = vld [vmem:[%s198_s23 + $0x8] sm:$0xff] }
  0x12   : > { %223 = vperm.xlu0 %361, %v220_v2  }
  0x89   : > { %v216_v3 = vpop.permute.xlu0 %215 }
  0x8a   : > { %v218_v6 = vmul.f32 %v216_v3, %v210_v4  ;;  %v219_v7 = vmul.f32 %v216_v3, %v211_v5 }
  0x8d   : > { %v224_v8 = vpop.permute.xlu0 %223 }
  0x8e   : > { %v226_v9 = vadd.f32 %v224_v8, %v218_v6  ;;  %v227_v10 = vadd.f32 %v224_v8, %v219_v7 }
  0x90   : > { %vm228_vm0 = vcmp.ge.f32.partialorder %v226_v9, 0.0  ;;  %vm229_vm1 = vcmp.ge.f32.partialorder %v227_v10, 0.0  ;;  %v230_v11 = vmul.f32 0.01, %v226_v9  ;;  %v231_v12 = vmul.f32 0.01, %v227_v10 }
  0x92   : > { %v232_v13 = vsel %vm228_vm0, %v226_v9, %v230_v11  ;;  %v233_v14 = vsel %vm229_vm1, %v227_v10, %v231_v12 }
  0x93   : > { %234 = vst [vmem:[%s208_s26] sm:$0xff] %v232_v13  ;;  %235 = vst [vmem:[%s208_s26 + $0x8] sm:$0xff] %v233_v14 }
  0x94 PF: > { %s13_s14 = sadd.s32 1, %s384_s14   ;;  %s450_s12 = smov %s380_s13 }
  0x95   : > { %p10_p5 = scmp.ge.s32.totalorder %s13_s14, 4   ;;  %s451_s13 = smov %s453_s15 }
  0x97   :  { %12 = sbr.rel (!%p10_p5) target bundleno = 2 (0x2), region = 62 }

// kernel: _lambda_.2
= control target key start
LH: loop header
LB: loop body
LE: loop exit
PB: predicated region body
PF: predicated region fallthrough
CT: control target
= control target key end

     0   :  { %s548_s15 = smov 0   ;;  %s550_s16 = smov 0   ;;  %s606_s0 = inlined_call_operand.vmem [shape: bf16[2,36,256], index: 0, kind: input, shape index: {}]   ;;  %s607_s1 = inlined_call_operand.vmem [shape: bf16[8,36], index: 1, kind: input, shape index: {}]   ;;  %s608_s2 = inlined_call_operand.vmem [shape: f32[2,8,256], index: 2, kind: output, shape index: {0}]   ;;  %s609_s3 = inlined_call_operand.vmem [shape: f32[8,1], index: 3, kind: output, shape index: {1}]   ;;  %s610_s4 = inlined_call_operand.vmem [shape: f32[8,1], index: 4, kind: output, shape index: {2}]  }
   0x1   :  { %s552_s17 = smov 0  }
   0x2 LB: > { %s27_s18 = sadd.s32 1, %s515_s16  ;;  %p445_p0 = scmp.ge.s32.totalorder %s519_s17, 1  ;;  %s519_s17 = sphi %s552_s17, %s15_s17   ;;  %s515_s16 = sphi %s550_s16, %s612_s16   ;;  %s511_s15 = sphi %s548_s15, %s611_s15  }
   0x3   : > { %p29_p1 = scmp.ge.s32.totalorder %s27_s18, 2  ;;  %p178_p2 = scmp.lt.s32.totalorder %s519_s17, 3 }
   0x5   : > { %s614_s18 = smov (%p29_p1, %s27_s18), 0  ;;  %p179_p3 = pnand %p445_p0, %p178_p2 }
   0x6   : > { %p213_p4 = scmp.lt.s32.totalorder (!%p179_p3), %s511_s15, 1  ;;  %p233_p5 = scmp.eq.s32.totalorder (!%p179_p3), %s511_s15, 0 }
   0x7   : > { %182 = sbr.rel (%p179_p3) target bundleno = 374 (0x176), region = 28 }
   0xc   : > { %s616_s15 = smov (!%p213_p4, %s511_s15), 1  ;;  %238 = sbr.rel (!%p233_p5) target bundleno = 17 (0x11), region = 32  ;;  %vm239_vm0 = vcmask (%p233_p5), 7168   ;;  %v521_v0 = vmov (%p233_p5), 0.0  }
   0xd   : > { %s462_s19 = smul.u32 40, %s616_s15  ;;  %s460_s20 = sshll.u32 %s616_s15, 4  ;;  %240 = vst.msk [vmem:[%s609_s3] sm:$0xff] (%p233_p5), %vm239_vm0, %v521_v0  ;;  %241 = vst.msk [vmem:[%s610_s4] sm:$0xff] (%p233_p5), %vm239_vm0, %v521_v0 }
   0xe   : > { %s569_s23 = scalar_lea.vmem %s608_s2, %s460_s20 }
   0xf   : > { %s220_s26 = scalar_lea.vmem %s606_s0, %s462_s19 }
  0x11 PF: > { %v247_v1 = vld [vmem:[%s220_s26 + $0x20] sm:$0x33]  ;;  %vm277_vm1 = vcmask 1041408   ;;  %v491_v4 = vld [vmem:[%s220_s26 + $0x14] ss:$8 sps:$4 sm:$0xff]   ;;  %v522_v5 = vmov 0  }
  0x12   : > { %v455_v2 = vcombine.high %v247_v1, %v247_v1  ;;  %v454_v3 = vcombine.low %v247_v1, %v247_v1  ;;  %316 = vmatprep.mubr.bf16.mxu0 %v522_v5  ;;  %v493_v7 = vld [vmem:[%s220_s26 + $0x10] ss:$8 sps:$4 sm:$0xff]   ;;  %v494_v8 = vld [vmem:[%s220_s26 + $0x4] ss:$8 sps:$4 sm:$0xff]   ;;  %v496_v9 = vld [vmem:[%s220_s26] ss:$8 sps:$4 sm:$0xff]  }
  0x13   : > { %v242_v10 = vld [vmem:[%s607_s1] sm:$0xf]  ;;  %vm273_vm2 = vcmask 293888   ;;  %vm332_vm3 = vcmask 7168  }
  0x14   : > { %456 = vmatprep.subr.msk.bf16.mxu0 %vm277_vm1, %v455_v2  ;;  %v279_v6 = vsel %vm277_vm1, %v454_v3, 0  ;;  %v327_v19 = vld [vmem:[%s609_s3] sm:$0xff] }
  0x15   : > { %295 = vmatpush1.bf16.msra.mxu0 %v279_v6  ;;  %v334_v22 = vld [vmem:[%s610_s4] sm:$0xff] }
  0x16   : > { %296 = vmatprep.subr.bf16.mxu0 %v491_v4 }
  0x19   : > { %297 = vmatpush1.bf16.msra.mxu0 %v493_v7 }
  0x1a   : > { %298 = vmatprep.subr.bf16.mxu0 %v494_v8 }
  0x1d   : > { %299 = vmatpush1.bf16.msra.mxu0 %v496_v9 }
  0x20   : > { %457 = vmatmul.mubr.msk.bf16.vlgmr.msra.gmra.mxu0 %vm273_vm2, %v242_v10 }
  0xe0   : > { %v318_v11 = vpop.f32.mrf.mxu0 }
  0xe1   : > { %325 = vst [vmem:[%s569_s23] sm:$0xff] %v318_v11  ;;  %v335_v16 = vmul.f32 %v318_v11, %v318_v11 }
  0xe2   : > { %v320_v12 = vpop.f32.mrf.mxu0 }
  0xe3   : > { %326 = vst [vmem:[%s569_s23 + $0x8] sm:$0xff] %v320_v12  ;;  %v328_v13 = vadd.f32 %v320_v12, %v318_v11  ;;  %v336_v14 = vmul.f32 %v320_v12, %v320_v12 }
  0xe4   : > { %v322_v15 = vpop.f32.mrf.mxu0 }
  0xe5   : > { %329 = vadd.xlane.f32.xlu0 %v328_v13  ;;  %v337_v18 = vadd.f32 %v336_v14, %v335_v16 }
  0xe6   : > { %v323_v17 = vpop.f32.mrf.mxu0 }
  0xe9   : > { %338 = vadd.xlane.f32.xlu0 %v337_v18 }
 0x16e   : > { %v330_v20 = vpop.xlane.xlu0 %329 }
 0x16f   : > { %v331_v21 = vadd.f32 %v330_v20, %v327_v19 }
 0x171   : > { %333 = vst.msk [vmem:[%s609_s3] sm:$0xff] %vm332_vm3, %v331_v21 }
 0x172   : > { %v339_v23 = vpop.xlane.xlu0 %338 }
 0x173   : > { %v340_v24 = vadd.f32 %v339_v23, %v334_v22 }
 0x175   : > { %341 = vst.msk [vmem:[%s610_s4] sm:$0xff] %vm332_vm3, %v340_v24 }
 0x176 PF: > { %s15_s17 = sadd.s32 1, %s519_s17   ;;  %s611_s15 = smov %s515_s16 }
 0x177   : > { %p12_p6 = scmp.ge.s32.totalorder %s15_s17, 4   ;;  %s612_s16 = smov %s614_s18 }
 0x179   :  { %14 = sbr.rel (!%p12_p6) target bundleno = 2 (0x2), region = 78 }

</bundles_post_ra>
